<compile_context>
chip_gen: v7x
topology: tpu7x:2x2x1
jax: 0.10.0
libtpu: 0.0.40
codegen_flags: <defaults>
</compile_context>

<pallas_src>
import functools

import numpy as np
import jax
import jax.numpy as jnp
from jax.experimental import pallas as pl
from jax.experimental.pallas import tpu as pltpu


def _upsample_matmul_kernel(x_ref, e_ref, o_ref):
    # x_ref: (Rb, g*W)           block of grouped input rows
    # e_ref: (g*W, g*s*s*W)      0/1 selection matrix (width interleave +
    #                            height replication folded together)
    # o_ref: (Rb, g*s*s*W)       grouped output super-rows, lane-dense
    acc_dtype = jnp.bfloat16 if o_ref.dtype == jnp.bfloat16 else jnp.float32
    o_ref[...] = jnp.dot(
        x_ref[...], e_ref[...], preferred_element_type=acc_dtype
    ).astype(o_ref.dtype)


def _expansion_matrix(width, group, stride, dtype):
    """(g*W, g*s*s*W) matrix with E[gi*W + w, gi*s*s*W + d*s*W + w*s + dj] = 1.

    One matmul with E performs, per grouped row, the full nearest-neighbor
    expansion: width interleave (factor s) and height replication (factor s),
    laid out exactly as the contiguous NCHW output expects.
    """
    s = stride
    gw = group * width
    gout = group * s * s * width
    p = np.arange(gw)
    q = np.arange(gout)
    src_g = p // width
    src_w = p % width
    dst_g = q // (s * s * width)
    dst_w = (q % (s * width)) // s
    e = (src_g[:, None] == dst_g[None, :]) & (src_w[:, None] == dst_w[None, :])
    return jnp.asarray(e, dtype=dtype)


def _sublane_pack(itemsize):
    # Sub-32-bit dtypes pack along sublanes: f32 -> 8, bf16 -> 16, int8/fp8 -> 32.
    return {4: 8, 2: 16, 1: 32}.get(itemsize, 8)


def _choose_group(n_rows, width, stride, itemsize):
    """Largest g dividing n_rows with g*W <= 256 and a small E matrix,
    preferring lane-aligned (multiple of 128) grouped widths."""
    max_g = max(1, 256 // width)
    e_cap = 8 * 1024 * 1024  # keep (double-buffered) E well under budget
    aligned, any_g = 0, 1
    for g in range(1, max_g + 1):
        if n_rows % g:
            continue
        e_bytes = (g * width) * (g * stride * stride * width) * itemsize
        if 2 * e_bytes > e_cap:
            break
        any_g = g
        if (g * width) % 128 == 0:
            aligned = g
    return aligned if aligned else any_g


def _vmem_capacity_bytes():
    try:
        return int(pltpu.get_tpu_info().vmem_capacity_bytes)
    except Exception:
        return 64 * 1024 * 1024  # conservative fallback (v7x per-TC size)


def _choose_tiling(n_grouped, in_lanes, out_lanes, itemsize, e_bytes):
    pack = _sublane_pack(itemsize)
    vmem_cap = _vmem_capacity_bytes()
    # Generation-aware scoped-VMEM ceiling: ~96 MiB on v5e/v6e, ~48 MiB on v7x.
    vmem_limit = min((vmem_cap * 3) // 4, 96 * 1024 * 1024)
    # Per-step working-set budget (double-buffered in/out + temp + E).
    budget = min(vmem_limit // 2, 40 * 1024 * 1024)

    fixed = 2 * e_bytes  # E may be double-buffered by the pipeline
    # 2x input block + 2x output block + 1x accumulator-width temp, per row.
    per_row = (2 * in_lanes + 3 * out_lanes) * itemsize
    rb = max(1, (budget - fixed) // per_row)

    # Prefer >= 8 grid steps (keeps both v7x TCs double-buffered; 1 TC on
    # v5e/v6e still overlaps DMA/compute), but never shrink a block below
    # ~1 MiB of output.
    out_row_bytes = max(1, out_lanes * itemsize)
    min_rows = max(pack, (1 << 20) // out_row_bytes)
    steps_cap = max(min_rows, -(-n_grouped // 8))
    rb = min(rb, steps_cap, n_grouped)

    if rb < n_grouped:
        rb = max(pack, rb - rb % pack)  # dtype-packed sublane multiple
        rb = min(rb, n_grouped)
    return int(rb), int(vmem_limit)


@functools.partial(jax.jit, static_argnames=("stride",))
def upsample(x, stride=2):
    assert x.ndim == 4, "expected NCHW input"
    B, C, H, W = x.shape
    s = int(stride)
    if s == 1:
        return x

    if not jnp.issubdtype(x.dtype, jnp.floating):
        # TODO(synk): integer/bool inputs need a copy-based Pallas path (the
        # 0/1 MXU matmul assumes float); use an exact pure-JAX broadcast here.
        y = jnp.broadcast_to(x[:, :, :, None, :, None], (B, C, H, s, W, s))
        return y.reshape(B, C, H * s, W * s)

    n_rows = B * C * H
    itemsize = x.dtype.itemsize
    g = _choose_group(n_rows, W, s, itemsize)
    in_lanes = g * W
    out_lanes = g * s * s * W
    n_grouped = n_rows // g

    e = _expansion_matrix(W, g, s, x.dtype)  # (in_lanes, out_lanes), 0/1
    e_bytes = in_lanes * out_lanes * itemsize
    rb, vmem_limit = _choose_tiling(n_grouped, in_lanes, out_lanes, itemsize,
                                    e_bytes)

    x_grouped = x.reshape(n_grouped, in_lanes)  # free row-major view
    grid = (pl.cdiv(n_grouped, rb),)

    out = pl.pallas_call(
        _upsample_matmul_kernel,
        out_shape=jax.ShapeDtypeStruct((n_grouped, out_lanes), x.dtype),
        grid_spec=pltpu.PrefetchScalarGridSpec(
            num_scalar_prefetch=0,
            grid=grid,
            in_specs=[
                pl.BlockSpec((rb, in_lanes), lambda i: (i, 0)),
                # Constant block index -> E is DMA'd once and reused each step.
                pl.BlockSpec((in_lanes, out_lanes), lambda i: (0, 0)),
            ],
            out_specs=pl.BlockSpec((rb, out_lanes), lambda i: (i, 0)),
        ),
        compiler_params=pltpu.CompilerParams(
            dimension_semantics=("parallel",),
            vmem_limit_bytes=vmem_limit,
        ),
    )(x_grouped, e)

    # Contiguous (free) reshape: (B*C*H/g, g*s*s*W) == (B, C, H*s, W*s).
    return out.reshape(B, C, H * s, W * s)


def _upsample_ref(x, stride=2):
    # Pure-JAX reference mirroring the PyTorch view/expand/view.
    B, C, H, W = x.shape
    y = jnp.broadcast_to(x[:, :, :, None, :, None], (B, C, H, stride, W, stride))
    return y.reshape(B, C, H * stride, W * stride)


if __name__ == "__main__":
    key = jax.random.PRNGKey(0)
    B, C, H, W = 2, 4, 16, 16
    stride = 2
    x = jax.random.normal(key, (B, C, H, W), dtype=jnp.float32)

    out = upsample(x, stride=stride)
    out = jax.block_until_ready(out)

    ref = _upsample_ref(x, stride=stride)
    assert out.shape == (B, C, H * stride, W * stride), out.shape
    assert out.dtype == x.dtype, out.dtype
    assert jnp.allclose(out, ref), "mismatch vs reference upsample"

    print("KERNEL_OK")
</pallas_src>

<mosaic_0001>
module attributes {stable_mosaic.version = 11 : i64} {
  func.func @_upsample_matmul_kernel(%arg0: i32, %arg1: memref<8x256xf32, #tpu.memory_space<vmem>>, %arg2: memref<256x1024xf32, #tpu.memory_space<vmem>>, %arg3: memref<8x1024xf32, #tpu.memory_space<vmem>>) attributes {dimension_semantics = [#tpu.dimension_semantics<parallel>], iteration_bounds = array<i64: 1>, scalar_prefetch = 0 : i64, scratch_operands = 0 : i64, tpu.core_type = #tpu.core_type<tc>, window_params = [{transform_indices = @transform_0, window_bounds = array<i64: 8, 256>}, {pipeline_mode = #tpu.pipeline_mode<synchronous>, transform_indices = @transform_1, window_bounds = array<i64: 256, 1024>}, {transform_indices = @transform_2, window_bounds = array<i64: 8, 1024>}]} {
    %c0 = arith.constant 0 : index
    %c0_0 = arith.constant 0 : index
    %0 = vector.load %arg1[%c0, %c0_0] : memref<8x256xf32, #tpu.memory_space<vmem>>, vector<8x256xf32>
    %c0_1 = arith.constant 0 : index
    %c0_2 = arith.constant 0 : index
    %1 = vector.load %arg2[%c0_1, %c0_2] : memref<256x1024xf32, #tpu.memory_space<vmem>>, vector<256x1024xf32>
    %cst = arith.constant dense<0.000000e+00> : vector<8x1024xf32>
    %2 = tpu.matmul %0, %1, %cst {dimension_numbers = #tpu.dot_dimension_numbers<[1], [0], [0], [1], [0, 0, 1, 1], [], []>} : vector<8x256xf32>, vector<256x1024xf32>, vector<8x1024xf32> -> vector<8x1024xf32>
    %c0_3 = arith.constant 0 : index
    %c0_4 = arith.constant 0 : index
    %3 = vector.load %arg3[%c0_3, %c0_4] : memref<8x1024xf32, #tpu.memory_space<vmem>>, vector<8x1024xf32>
    tpu.vector_store %arg3[%c0_3, %c0_4], %2 {strides = array<i32>} : memref<8x1024xf32, #tpu.memory_space<vmem>>, vector<8x1024xf32>,
    return
  }
  func.func @transform_0(%arg0: i32) -> (i32, i32) {
    %c0_i32 = arith.constant 0 : i32
    %c0_i32_0 = arith.constant 0 : i32
    return %arg0, %c0_i32 : i32, i32
  }
  func.func @transform_1(%arg0: i32) -> (i32, i32) {
    %c0_i32 = arith.constant 0 : i32
    %c0_i32_0 = arith.constant 0 : i32
    %c0_i32_1 = arith.constant 0 : i32
    return %c0_i32, %c0_i32_0 : i32, i32
  }
  func.func @transform_2(%arg0: i32) -> (i32, i32) {
    %c0_i32 = arith.constant 0 : i32
    %c0_i32_0 = arith.constant 0 : i32
    return %arg0, %c0_i32 : i32, i32
  }
}

</mosaic_0001>

<bundles_post_ra>
// kernel: upsample.1
= control target key start
LH: loop header
LB: loop body
LE: loop exit
PB: predicated region body
PF: predicated region fallthrough
CT: control target
= control target key end

     0   :  { %7 = vsyncpa [#allocation3], 0  ;;  %s863_s9 = smov [#allocation2]   ;;  %s935_s0 = inlined_call_operand.vmem [shape: f32[8,256], index: 0, kind: input, shape index: {}]   ;;  %s936_s1 = inlined_call_operand.hbm [shape: f32[256,1024], index: 1, kind: input, shape index: {}]   ;;  %s937_s2 = inlined_call_operand.vmem [shape: f32[8,1024], index: 2, kind: output, shape index: {}]  }
   0x1   :  { %s15_s10 = sshll.u32 %s863_s9, 4  ;;  %s839_s13 = scalar_lea.hbm %s936_s1, 32768  ;;  %s16_s10 = int_to_ptr.vmem [resolvable:$true] %s15_s10 }
   0x2   :  { %p840_p0 = scmp.ne.s32.totalorder %s936_s1, %s839_s13  ;;  %p843_p1 = scmp.lt.u32.totalorder %s839_s13, %s936_s1 }
   0x4   :  { %p845_p2 = pnand %p843_p1, %p840_p0 }
   0x6   :  { %848 = shalt.err (!%p845_p2)
}
   0x7   :  { %s849_s18 = scalar_lea.vmem %s16_s10, 32768  ;;  %p854_p4 = scmp.lt.s32.totalorder %s16_s10, %s16_s10 }
   0x8   :  { %p850_p3 = scmp.ne.s32.totalorder %s16_s10, %s849_s18  ;;  %p855_p5 = scmp.lt.s32.totalorder %s849_s18, %s849_s18 }
   0xa   :  { %p856_p6 = por %p855_p5, %p854_p4 }
   0xc   :  { %p857_p7 = pnand %p856_p6, %p850_p3 }
   0xe   :  { %860 = shalt.err (!%p857_p7)
}
   0xf   :  { %s864_s19 = smov 1024   ;;  %s865_s20 = smov 64  }
  0x10   :  { %21 = dma.hbm_to_vmem [thread:$0]  %s936_s1, 32768, %s16_s10, [#allocation3], %s864_s19, %s864_s19, %s865_s20  }
  0x11   :  { %861 = dma.done.wait [#allocation3], 32768  }
  0x12   :  { %862 = vsyncadd [#allocation3], 4294934528  ;;  %v28_v0 = vld [vmem:[#allocation2 + $0x8] sm:$0xff]  ;;  %v30_v2 = vld [vmem:[#allocation2 + $0x18] sm:$0xff] }
  0x13   :  { %v36_v1 = vld [vmem:[#allocation2 + $0x48] sm:$0xff]  ;;  %v38_v4 = vld [vmem:[#allocation2 + $0x58] sm:$0xff]  ;;  %v27_v5 = vld [vmem:[#allocation2] sm:$0xff] }
  0x14   :  { %v580_v3 = vpack.c.bf16 %v36_v1, %v28_v0  ;;  %v35_v6 = vld [vmem:[#allocation2 + $0x40] sm:$0xff]  ;;  %v644_v7 = vpack.c.bf16 %v38_v4, %v30_v2  ;;  %v29_v9 = vld [vmem:[#allocation2 + $0x10] sm:$0xff]  ;;  %v44_v11 = vld [vmem:[#allocation2 + $0x88] sm:$0xff] }
  0x15   :  { %v582_v8 = vpack.c.bf16 %v35_v6, %v27_v5  ;;  %v37_v10 = vld [vmem:[#allocation2 + $0x50] sm:$0xff]  ;;  %v52_v13 = vld [vmem:[#allocation2 + $0xc8] sm:$0xff]  ;;  %v46_v14 = vld [vmem:[#allocation2 + $0x98] sm:$0xff] }
  0x16   :  { %581 = vmatprep.subr.bf16.mxu0 %v580_v3  ;;  %v646_v12 = vpack.c.bf16 %v37_v10, %v29_v9  ;;  %v54_v15 = vld [vmem:[#allocation2 + $0xd8] sm:$0xff]  ;;  %645 = vmatprep.subr.bf16.mxu1 %v644_v7  ;;  %v584_v16 = vpack.c.bf16 %v52_v13, %v44_v11  ;;  %v43_v18 = vld [vmem:[#allocation2 + $0x80] sm:$0xff]  ;;  %v45_v20 = vld [vmem:[#allocation2 + $0x90] sm:$0xff] }
  0x17   :  { %583 = vmatpush1.bf16.msra.mxu0 %v582_v8  ;;  %v648_v17 = vpack.c.bf16 %v54_v15, %v46_v14  ;;  %v51_v19 = vld [vmem:[#allocation2 + $0xc0] sm:$0xff]  ;;  %v53_v22 = vld [vmem:[#allocation2 + $0xd0] sm:$0xff]  ;;  %v60_v23 = vld [vmem:[#allocation2 + $0x108] sm:$0xff] }
  0x18   :  { %647 = vmatpush1.bf16.msra.mxu1 %v646_v12  ;;  %v586_v21 = vpack.c.bf16 %v51_v19, %v43_v18  ;;  %v68_v24 = vld [vmem:[#allocation2 + $0x148] sm:$0xff]  ;;  %585 = vmatprep.subr.bf16.mxu0 %v584_v16  ;;  %v650_v25 = vpack.c.bf16 %v53_v22, %v45_v20  ;;  %v62_v27 = vld [vmem:[#allocation2 + $0x118] sm:$0xff]  ;;  %v59_v29 = vld [vmem:[#allocation2 + $0x100] sm:$0xff] }
  0x19   :  { %649 = vmatprep.subr.bf16.mxu1 %v648_v17  ;;  %v588_v26 = vpack.c.bf16 %v68_v24, %v60_v23  ;;  %v70_v28 = vld [vmem:[#allocation2 + $0x158] sm:$0xff]  ;;  %v67_v31 = vld [vmem:[#allocation2 + $0x140] sm:$0xff]  ;;  %v61_v32 = vld [vmem:[#allocation2 + $0x110] sm:$0xff] }
  0x1a   :  { %v652_v30 = vpack.c.bf16 %v70_v28, %v62_v27  ;;  %v69_v33 = vld [vmem:[#allocation2 + $0x150] sm:$0xff]  ;;  %v590_v34 = vpack.c.bf16 %v67_v31, %v59_v29  ;;  %v76_v35 = vld [vmem:[#allocation2 + $0x188] sm:$0xff]  ;;  %v78_v37 = vld [vmem:[#allocation2 + $0x198] sm:$0xff] }
  0x1b   :  { %587 = vmatpush1.bf16.msra.mxu0 %v586_v21  ;;  %v84_v36 = vld [vmem:[#allocation2 + $0x1c8] sm:$0xff]  ;;  %v654_v38 = vpack.c.bf16 %v69_v33, %v61_v32  ;;  %v86_v40 = vld [vmem:[#allocation2 + $0x1d8] sm:$0xff]  ;;  %v75_v41 = vld [vmem:[#allocation2 + $0x180] sm:$0xff] }
  0x1c   :  { %651 = vmatpush1.bf16.msra.mxu1 %v650_v25  ;;  %589 = vmatprep.subr.bf16.mxu0 %v588_v26  ;;  %v592_v39 = vpack.c.bf16 %v84_v36, %v76_v35  ;;  %v83_v42 = vld [vmem:[#allocation2 + $0x1c0] sm:$0xff]  ;;  %v656_v43 = vpack.c.bf16 %v86_v40, %v78_v37  ;;  %v77_v44 = vld [vmem:[#allocation2 + $0x190] sm:$0xff]  ;;  %v92_v46 = vld [vmem:[#allocation2 + $0x208] sm:$0xff] }
  0x1d   :  { %653 = vmatprep.subr.bf16.mxu1 %v652_v30  ;;  %v85_v45 = vld [vmem:[#allocation2 + $0x1d0] sm:$0xff]  ;;  %v100_v47 = vld [vmem:[#allocation2 + $0x248] sm:$0xff]  ;;  %v94_v48 = vld [vmem:[#allocation2 + $0x218] sm:$0xff]  ;;  %v594_v50 = vpack.c.bf16 %v83_v42, %v75_v41 }
  0x1e   :  { %v102_v49 = vld [vmem:[#allocation2 + $0x258] sm:$0xff]  ;;  %v658_v51 = vpack.c.bf16 %v85_v45, %v77_v44  ;;  %v596_v52 = vpack.c.bf16 %v100_v47, %v92_v46  ;;  %v91_v53 = vld [vmem:[#allocation2 + $0x200] sm:$0xff]  ;;  %v93_v55 = vld [vmem:[#allocation2 + $0x210] sm:$0xff] }
  0x1f   :  { %591 = vmatpush1.bf16.msra.mxu0 %v590_v34  ;;  %v99_v54 = vld [vmem:[#allocation2 + $0x240] sm:$0xff]  ;;  %v660_v56 = vpack.c.bf16 %v102_v49, %v94_v48  ;;  %v101_v57 = vld [vmem:[#allocation2 + $0x250] sm:$0xff]  ;;  %v108_v58 = vld [vmem:[#allocation2 + $0x288] sm:$0xff] }
  0x20   :  { %655 = vmatpush1.bf16.msra.mxu1 %v654_v38  ;;  %593 = vmatprep.subr.bf16.mxu0 %v592_v39  ;;  %v116_v59 = vld [vmem:[#allocation2 + $0x2c8] sm:$0xff]  ;;  %v110_v60 = vld [vmem:[#allocation2 + $0x298] sm:$0xff]  ;;  %v598_v62 = vpack.c.bf16 %v99_v54, %v91_v53  ;;  %v662_v63 = vpack.c.bf16 %v101_v57, %v93_v55  ;;  %v107_v1 = vld [vmem:[#allocation2 + $0x280] sm:$0xff] }
  0x21   :  { %657 = vmatprep.subr.bf16.mxu1 %v656_v43  ;;  %v118_v61 = vld [vmem:[#allocation2 + $0x2d8] sm:$0xff]  ;;  %v600_v0 = vpack.c.bf16 %v116_v59, %v108_v58  ;;  %v115_v2 = vld [vmem:[#allocation2 + $0x2c0] sm:$0xff]  ;;  %v109_v3 = vld [vmem:[#allocation2 + $0x290] sm:$0xff] }
  0x22   :  { %v664_v4 = vpack.c.bf16 %v118_v61, %v110_v60  ;;  %v117_v5 = vld [vmem:[#allocation2 + $0x2d0] sm:$0xff]  ;;  %v124_v6 = vld [vmem:[#allocation2 + $0x308] sm:$0xff]  ;;  %v126_v8 = vld [vmem:[#allocation2 + $0x318] sm:$0xff]  ;;  %v602_v10 = vpack.c.bf16 %v115_v2, %v107_v1 }
  0x23   :  { %595 = vmatpush1.bf16.msra.mxu0 %v594_v50  ;;  %v132_v7 = vld [vmem:[#allocation2 + $0x348] sm:$0xff]  ;;  %v134_v9 = vld [vmem:[#allocation2 + $0x358] sm:$0xff]  ;;  %v666_v11 = vpack.c.bf16 %v117_v5, %v109_v3  ;;  %v123_v13 = vld [vmem:[#allocation2 + $0x300] sm:$0xff] }
  0x24   :  { %659 = vmatpush1.bf16.msra.mxu1 %v658_v51  ;;  %597 = vmatprep.subr.bf16.mxu0 %v596_v52  ;;  %v604_v12 = vpack.c.bf16 %v132_v7, %v124_v6  ;;  %v131_v14 = vld [vmem:[#allocation2 + $0x340] sm:$0xff]  ;;  %v125_v15 = vld [vmem:[#allocation2 + $0x310] sm:$0xff]  ;;  %v668_v16 = vpack.c.bf16 %v134_v9, %v126_v8  ;;  %v140_v18 = vld [vmem:[#allocation2 + $0x388] sm:$0xff] }
  0x25   :  { %661 = vmatprep.subr.bf16.mxu1 %v660_v56  ;;  %v133_v17 = vld [vmem:[#allocation2 + $0x350] sm:$0xff]  ;;  %v148_v19 = vld [vmem:[#allocation2 + $0x3c8] sm:$0xff]  ;;  %v142_v20 = vld [vmem:[#allocation2 + $0x398] sm:$0xff]  ;;  %v606_v22 = vpack.c.bf16 %v131_v14, %v123_v13 }
  0x26   :  { %v150_v21 = vld [vmem:[#allocation2 + $0x3d8] sm:$0xff]  ;;  %v670_v23 = vpack.c.bf16 %v133_v17, %v125_v15  ;;  %v608_v24 = vpack.c.bf16 %v148_v19, %v140_v18  ;;  %v139_v25 = vld [vmem:[#allocation2 + $0x380] sm:$0xff]  ;;  %v141_v27 = vld [vmem:[#allocation2 + $0x390] sm:$0xff] }
  0x27   :  { %599 = vmatpush1.bf16.msra.mxu0 %v598_v62  ;;  %v147_v26 = vld [vmem:[#allocation2 + $0x3c0] sm:$0xff]  ;;  %v672_v28 = vpack.c.bf16 %v150_v21, %v142_v20  ;;  %v149_v29 = vld [vmem:[#allocation2 + $0x3d0] sm:$0xff]  ;;  %v156_v30 = vld [vmem:[#allocation2 + $0x408] sm:$0xff] }
  0x28   :  { %663 = vmatpush1.bf16.msra.mxu1 %v662_v63  ;;  %601 = vmatprep.subr.bf16.mxu0 %v600_v0  ;;  %v164_v31 = vld [vmem:[#allocation2 + $0x448] sm:$0xff]  ;;  %v158_v32 = vld [vmem:[#allocation2 + $0x418] sm:$0xff]  ;;  %v610_v34 = vpack.c.bf16 %v147_v26, %v139_v25  ;;  %v674_v35 = vpack.c.bf16 %v149_v29, %v141_v27  ;;  %v155_v37 = vld [vmem:[#allocation2 + $0x400] sm:$0xff] }
  0x29   :  { %665 = vmatprep.subr.bf16.mxu1 %v664_v4  ;;  %v166_v33 = vld [vmem:[#allocation2 + $0x458] sm:$0xff]  ;;  %v612_v36 = vpack.c.bf16 %v164_v31, %v156_v30  ;;  %v163_v38 = vld [vmem:[#allocation2 + $0x440] sm:$0xff]  ;;  %v157_v39 = vld [vmem:[#allocation2 + $0x410] sm:$0xff] }
  0x2a   :  { %v676_v40 = vpack.c.bf16 %v166_v33, %v158_v32  ;;  %v165_v41 = vld [vmem:[#allocation2 + $0x450] sm:$0xff]  ;;  %v172_v42 = vld [vmem:[#allocation2 + $0x488] sm:$0xff]  ;;  %v174_v44 = vld [vmem:[#allocation2 + $0x498] sm:$0xff]  ;;  %v614_v46 = vpack.c.bf16 %v163_v38, %v155_v37 }
  0x2b   :  { %603 = vmatpush1.bf16.msra.mxu0 %v602_v10  ;;  %v180_v43 = vld [vmem:[#allocation2 + $0x4c8] sm:$0xff]  ;;  %v182_v45 = vld [vmem:[#allocation2 + $0x4d8] sm:$0xff]  ;;  %v678_v47 = vpack.c.bf16 %v165_v41, %v157_v39  ;;  %v171_v49 = vld [vmem:[#allocation2 + $0x480] sm:$0xff] }
  0x2c   :  { %667 = vmatpush1.bf16.msra.mxu1 %v666_v11  ;;  %605 = vmatprep.subr.bf16.mxu0 %v604_v12  ;;  %v616_v48 = vpack.c.bf16 %v180_v43, %v172_v42  ;;  %v179_v50 = vld [vmem:[#allocation2 + $0x4c0] sm:$0xff]  ;;  %v173_v51 = vld [vmem:[#allocation2 + $0x490] sm:$0xff]  ;;  %v680_v52 = vpack.c.bf16 %v182_v45, %v174_v44  ;;  %v188_v54 = vld [vmem:[#allocation2 + $0x508] sm:$0xff] }
  0x2d   :  { %669 = vmatprep.subr.bf16.mxu1 %v668_v16  ;;  %v181_v53 = vld [vmem:[#allocation2 + $0x4d0] sm:$0xff]  ;;  %v196_v55 = vld [vmem:[#allocation2 + $0x548] sm:$0xff]  ;;  %v190_v56 = vld [vmem:[#allocation2 + $0x518] sm:$0xff]  ;;  %v618_v58 = vpack.c.bf16 %v179_v50, %v171_v49 }
  0x2e   :  { %v198_v57 = vld [vmem:[#allocation2 + $0x558] sm:$0xff]  ;;  %v682_v59 = vpack.c.bf16 %v181_v53, %v173_v51  ;;  %v620_v60 = vpack.c.bf16 %v196_v55, %v188_v54  ;;  %v187_v61 = vld [vmem:[#allocation2 + $0x500] sm:$0xff]  ;;  %v189_v63 = vld [vmem:[#allocation2 + $0x510] sm:$0xff] }
  0x2f   :  { %607 = vmatpush1.bf16.msra.mxu0 %v606_v22  ;;  %v195_v62 = vld [vmem:[#allocation2 + $0x540] sm:$0xff]  ;;  %v684_v0 = vpack.c.bf16 %v198_v57, %v190_v56  ;;  %v197_v1 = vld [vmem:[#allocation2 + $0x550] sm:$0xff]  ;;  %v204_v2 = vld [vmem:[#allocation2 + $0x588] sm:$0xff] }
  0x30   :  { %671 = vmatpush1.bf16.msra.mxu1 %v670_v23  ;;  %609 = vmatprep.subr.bf16.mxu0 %v608_v24  ;;  %v212_v3 = vld [vmem:[#allocation2 + $0x5c8] sm:$0xff]  ;;  %v206_v4 = vld [vmem:[#allocation2 + $0x598] sm:$0xff]  ;;  %v622_v6 = vpack.c.bf16 %v195_v62, %v187_v61  ;;  %v203_v7 = vld [vmem:[#allocation2 + $0x580] sm:$0xff]  ;;  %v686_v8 = vpack.c.bf16 %v197_v1, %v189_v63 }
  0x31   :  { %673 = vmatprep.subr.bf16.mxu1 %v672_v28  ;;  %v214_v5 = vld [vmem:[#allocation2 + $0x5d8] sm:$0xff]  ;;  %v624_v9 = vpack.c.bf16 %v212_v3, %v204_v2  ;;  %v211_v10 = vld [vmem:[#allocation2 + $0x5c0] sm:$0xff]  ;;  %v205_v11 = vld [vmem:[#allocation2 + $0x590] sm:$0xff] }
  0x32   :  { %v213_v12 = vld [vmem:[#allocation2 + $0x5d0] sm:$0xff]  ;;  %v688_v13 = vpack.c.bf16 %v214_v5, %v206_v4  ;;  %v220_v14 = vld [vmem:[#allocation2 + $0x608] sm:$0xff]  ;;  %v222_v17 = vld [vmem:[#allocation2 + $0x618] sm:$0xff]  ;;  %v626_v19 = vpack.c.bf16 %v211_v10, %v203_v7 }
  0x33   :  { %611 = vmatpush1.bf16.msra.mxu0 %v610_v34  ;;  %v228_v15 = vld [vmem:[#allocation2 + $0x648] sm:$0xff]  ;;  %v230_v18 = vld [vmem:[#allocation2 + $0x658] sm:$0xff]  ;;  %v690_v20 = vpack.c.bf16 %v213_v12, %v205_v11  ;;  %v219_v22 = vld [vmem:[#allocation2 + $0x600] sm:$0xff] }
  0x34   :  { %675 = vmatpush1.bf16.msra.mxu1 %v674_v35  ;;  %613 = vmatprep.subr.bf16.mxu0 %v612_v36  ;;  %v896_v16 = vld [vmem:[%s935_s0 + $0x8] sm:$0xff]  ;;  %v628_v21 = vpack.c.bf16 %v228_v15, %v220_v14  ;;  %v227_v23 = vld [vmem:[#allocation2 + $0x640] sm:$0xff]  ;;  %v221_v24 = vld [vmem:[#allocation2 + $0x610] sm:$0xff]  ;;  %v692_v25 = vpack.c.bf16 %v230_v18, %v222_v17 }
  0x35   :  { %677 = vmatprep.subr.bf16.mxu1 %v676_v40  ;;  %347 = vmatprep.mubr.f32.mxu0 %v896_v16  ;;  %v229_v26 = vld [vmem:[#allocation2 + $0x650] sm:$0xff]  ;;  %v236_v27 = vld [vmem:[#allocation2 + $0x688] sm:$0xff]  ;;  %v238_v29 = vld [vmem:[#allocation2 + $0x698] sm:$0xff]  ;;  %v630_v31 = vpack.c.bf16 %v227_v23, %v219_v22 }
  0x36   :  { %418 = vmatprep.mubr.f32.mxu1 %v896_v16  ;;  %v244_v28 = vld [vmem:[#allocation2 + $0x6c8] sm:$0xff]  ;;  %v246_v30 = vld [vmem:[#allocation2 + $0x6d8] sm:$0xff]  ;;  %v694_v32 = vpack.c.bf16 %v229_v26, %v221_v24  ;;  %v235_v34 = vld [vmem:[#allocation2 + $0x680] sm:$0xff] }
  0x37   :  { %615 = vmatpush1.bf16.msra.mxu0 %v614_v46  ;;  %v632_v33 = vpack.c.bf16 %v244_v28, %v236_v27  ;;  %v243_v35 = vld [vmem:[#allocation2 + $0x6c0] sm:$0xff]  ;;  %v237_v36 = vld [vmem:[#allocation2 + $0x690] sm:$0xff]  ;;  %v696_v37 = vpack.c.bf16 %v246_v30, %v238_v29  ;;  %v252_v39 = vld [vmem:[#allocation2 + $0x708] sm:$0xff] }
  0x38   :  { %679 = vmatpush1.bf16.msra.mxu1 %v678_v47  ;;  %617 = vmatprep.subr.bf16.mxu0 %v616_v48  ;;  %v245_v38 = vld [vmem:[#allocation2 + $0x6d0] sm:$0xff]  ;;  %v260_v40 = vld [vmem:[#allocation2 + $0x748] sm:$0xff]  ;;  %v254_v41 = vld [vmem:[#allocation2 + $0x718] sm:$0xff]  ;;  %v634_v43 = vpack.c.bf16 %v243_v35, %v235_v34 }
  0x39   :  { %681 = vmatprep.subr.bf16.mxu1 %v680_v52  ;;  %v262_v42 = vld [vmem:[#allocation2 + $0x758] sm:$0xff]  ;;  %v698_v44 = vpack.c.bf16 %v245_v38, %v237_v36  ;;  %v636_v45 = vpack.c.bf16 %v260_v40, %v252_v39  ;;  %v251_v46 = vld [vmem:[#allocation2 + $0x700] sm:$0xff]  ;;  %v253_v48 = vld [vmem:[#allocation2 + $0x710] sm:$0xff] }
  0x3a   :  { %v259_v47 = vld [vmem:[#allocation2 + $0x740] sm:$0xff]  ;;  %v700_v49 = vpack.c.bf16 %v262_v42, %v254_v41  ;;  %v261_v50 = vld [vmem:[#allocation2 + $0x750] sm:$0xff]  ;;  %v268_v51 = vld [vmem:[#allocation2 + $0x788] sm:$0xff] }
  0x3b   :  { %619 = vmatpush1.bf16.msra.mxu0 %v618_v58  ;;  %v276_v52 = vld [vmem:[#allocation2 + $0x7c8] sm:$0xff]  ;;  %v270_v53 = vld [vmem:[#allocation2 + $0x798] sm:$0xff]  ;;  %v638_v55 = vpack.c.bf16 %v259_v47, %v251_v46  ;;  %v702_v56 = vpack.c.bf16 %v261_v50, %v253_v48  ;;  %v267_v58 = vld [vmem:[#allocation2 + $0x780] sm:$0xff] }
  0x3c   :  { %683 = vmatpush1.bf16.msra.mxu1 %v682_v59  ;;  %621 = vmatprep.subr.bf16.mxu0 %v620_v60  ;;  %v278_v54 = vld [vmem:[#allocation2 + $0x7d8] sm:$0xff]  ;;  %v640_v57 = vpack.c.bf16 %v276_v52, %v268_v51  ;;  %v275_v59 = vld [vmem:[#allocation2 + $0x7c0] sm:$0xff]  ;;  %v269_v60 = vld [vmem:[#allocation2 + $0x790] sm:$0xff] }
  0x3d   :  { %685 = vmatprep.subr.bf16.mxu1 %v684_v0  ;;  %v704_v61 = vpack.c.bf16 %v278_v54, %v270_v53  ;;  %v277_v62 = vld [vmem:[#allocation2 + $0x7d0] sm:$0xff]  ;;  %v32_v63 = vld [vmem:[#allocation2 + $0x28] sm:$0xff]  ;;  %v34_v1 = vld [vmem:[#allocation2 + $0x38] sm:$0xff]  ;;  %v642_v3 = vpack.c.bf16 %v275_v59, %v267_v58 }
  0x3e   :  { %v40_v0 = vld [vmem:[#allocation2 + $0x68] sm:$0xff]  ;;  %v42_v2 = vld [vmem:[#allocation2 + $0x78] sm:$0xff]  ;;  %v706_v4 = vpack.c.bf16 %v277_v62, %v269_v60  ;;  %v39_v7 = vld [vmem:[#allocation2 + $0x60] sm:$0xff] }
  0x3f   :  { %623 = vmatpush1.bf16.msra.mxu0 %v622_v6  ;;  %v708_v5 = vpack.c.bf16 %v40_v0, %v32_v63  ;;  %v31_v6 = vld [vmem:[#allocation2 + $0x20] sm:$0xff]  ;;  %v41_v10 = vld [vmem:[#allocation2 + $0x70] sm:$0xff]  ;;  %v48_v11 = vld [vmem:[#allocation2 + $0xa8] sm:$0xff] }
  0x40   :  { %687 = vmatpush1.bf16.msra.mxu1 %v686_v8  ;;  %625 = vmatprep.subr.bf16.mxu0 %v624_v9  ;;  %v33_v8 = vld [vmem:[#allocation2 + $0x30] sm:$0xff]  ;;  %v772_v9 = vpack.c.bf16 %v42_v2, %v34_v1  ;;  %v56_v12 = vld [vmem:[#allocation2 + $0xe8] sm:$0xff]  ;;  %v58_v14 = vld [vmem:[#allocation2 + $0xf8] sm:$0xff]  ;;  %v710_v17 = vpack.c.bf16 %v39_v7, %v31_v6 }
  0x41   :  { %689 = vmatprep.subr.bf16.mxu1 %v688_v13  ;;  %v50_v13 = vld [vmem:[#allocation2 + $0xb8] sm:$0xff]  ;;  %v903_v15 = vld [vmem:[%s935_s0] sm:$0xff]  ;;  %v774_v18 = vpack.c.bf16 %v41_v10, %v33_v8  ;;  %v49_v22 = vld [vmem:[#allocation2 + $0xb0] sm:$0xff] }
  0x42   :  { %v776_v23 = vpack.c.bf16 %v58_v14, %v50_v13  ;;  %v57_v24 = vld [vmem:[#allocation2 + $0xf0] sm:$0xff]  ;;  %v72_v26 = vld [vmem:[#allocation2 + $0x168] sm:$0xff]  ;;  %v66_v27 = vld [vmem:[#allocation2 + $0x138] sm:$0xff] }
  0x43   :  { %627 = vmatpush1.bf16.msra.mxu0 %v626_v19  ;;  %v712_v19 = vpack.c.bf16 %v56_v12, %v48_v11  ;;  %v74_v28 = vld [vmem:[#allocation2 + $0x178] sm:$0xff]  ;;  %v778_v30 = vpack.c.bf16 %v57_v24, %v49_v22  ;;  %v65_v34 = vld [vmem:[#allocation2 + $0x130] sm:$0xff]  ;;  %v88_v38 = vld [vmem:[#allocation2 + $0x1e8] sm:$0xff] }
  0x44   :  { %691 = vmatpush1.bf16.msra.mxu1 %v690_v20  ;;  %629 = vmatprep.subr.bf16.mxu0 %v628_v21  ;;  %v47_v20 = vld [vmem:[#allocation2 + $0xa0] sm:$0xff]  ;;  %v780_v35 = vpack.c.bf16 %v74_v28, %v66_v27  ;;  %v73_v36 = vld [vmem:[#allocation2 + $0x170] sm:$0xff]  ;;  %v82_v39 = vld [vmem:[#allocation2 + $0x1b8] sm:$0xff] }
  0x45   :  { %693 = vmatprep.subr.bf16.mxu1 %v692_v25  ;;  %v55_v21 = vld [vmem:[#allocation2 + $0xe0] sm:$0xff]  ;;  %v64_v25 = vld [vmem:[#allocation2 + $0x128] sm:$0xff]  ;;  %v90_v40 = vld [vmem:[#allocation2 + $0x1f8] sm:$0xff]  ;;  %v782_v42 = vpack.c.bf16 %v73_v36, %v65_v34 }
  0x46   :  { %v714_v29 = vpack.c.bf16 %v55_v21, %v47_v20  ;;  %v81_v46 = vld [vmem:[#allocation2 + $0x1b0] sm:$0xff]  ;;  %v784_v47 = vpack.c.bf16 %v90_v40, %v82_v39  ;;  %v104_v50 = vld [vmem:[#allocation2 + $0x268] sm:$0xff]  ;;  %v98_v51 = vld [vmem:[#allocation2 + $0x238] sm:$0xff] }
  0x47   :  { %631 = vmatpush1.bf16.msra.mxu0 %v630_v31  ;;  %v716_v31 = vpack.c.bf16 %v72_v26, %v64_v25  ;;  %v89_v48 = vld [vmem:[#allocation2 + $0x1f0] sm:$0xff]  ;;  %v106_v52 = vld [vmem:[#allocation2 + $0x278] sm:$0xff]  ;;  %v112_v60 = vld [vmem:[#allocation2 + $0x2a8] sm:$0xff] }
  0x48   :  { %695 = vmatpush1.bf16.msra.mxu1 %v694_v32  ;;  %633 = vmatprep.subr.bf16.mxu0 %v632_v33  ;;  %v63_v32 = vld [vmem:[#allocation2 + $0x120] sm:$0xff]  ;;  %v788_v58 = vpack.c.bf16 %v106_v52, %v98_v51  ;;  %v105_v59 = vld [vmem:[#allocation2 + $0x270] sm:$0xff]  ;;  %v114_v62 = vld [vmem:[#allocation2 + $0x2b8] sm:$0xff] }
  0x49   :  { %697 = vmatprep.subr.bf16.mxu1 %v696_v37  ;;  %v71_v33 = vld [vmem:[#allocation2 + $0x160] sm:$0xff]  ;;  %v80_v37 = vld [vmem:[#allocation2 + $0x1a8] sm:$0xff]  ;;  %v122_v63 = vld [vmem:[#allocation2 + $0x2f8] sm:$0xff] }
  0x4a   :  { %v718_v41 = vpack.c.bf16 %v71_v33, %v63_v32  ;;  %v792_v6 = vpack.c.bf16 %v122_v63, %v114_v62  ;;  %v121_v7 = vld [vmem:[#allocation2 + $0x2f0] sm:$0xff]  ;;  %v128_v8 = vld [vmem:[#allocation2 + $0x328] sm:$0xff]  ;;  %v130_v10 = vld [vmem:[#allocation2 + $0x338] sm:$0xff] }
  0x4b   :  { %635 = vmatpush1.bf16.msra.mxu0 %v634_v43  ;;  %v720_v43 = vpack.c.bf16 %v88_v38, %v80_v37  ;;  %v138_v11 = vld [vmem:[#allocation2 + $0x378] sm:$0xff]  ;;  %v137_v21 = vld [vmem:[#allocation2 + $0x370] sm:$0xff]  ;;  %v144_v22 = vld [vmem:[#allocation2 + $0x3a8] sm:$0xff] }
  0x4c   :  { %699 = vmatpush1.bf16.msra.mxu1 %v698_v44  ;;  %637 = vmatprep.subr.bf16.mxu0 %v636_v45  ;;  %v79_v44 = vld [vmem:[#allocation2 + $0x1a0] sm:$0xff]  ;;  %v796_v20 = vpack.c.bf16 %v138_v11, %v130_v10  ;;  %v146_v24 = vld [vmem:[#allocation2 + $0x3b8] sm:$0xff]  ;;  %v153_v33 = vld [vmem:[#allocation2 + $0x3f0] sm:$0xff] }
  0x4d   :  { %701 = vmatprep.subr.bf16.mxu1 %v700_v49  ;;  %v87_v45 = vld [vmem:[#allocation2 + $0x1e0] sm:$0xff]  ;;  %v96_v49 = vld [vmem:[#allocation2 + $0x228] sm:$0xff]  ;;  %v154_v25 = vld [vmem:[#allocation2 + $0x3f8] sm:$0xff] }
  0x4e   :  { %v722_v53 = vpack.c.bf16 %v87_v45, %v79_v44  ;;  %v724_v54 = vpack.c.bf16 %v104_v50, %v96_v49  ;;  %v800_v32 = vpack.c.bf16 %v154_v25, %v146_v24  ;;  %v160_v34 = vld [vmem:[#allocation2 + $0x428] sm:$0xff]  ;;  %v162_v36 = vld [vmem:[#allocation2 + $0x438] sm:$0xff]  ;;  %v169_v45 = vld [vmem:[#allocation2 + $0x470] sm:$0xff] }
  0x4f   :  { %639 = vmatpush1.bf16.msra.mxu0 %v638_v55  ;;  %v95_v55 = vld [vmem:[#allocation2 + $0x220] sm:$0xff]  ;;  %v170_v37 = vld [vmem:[#allocation2 + $0x478] sm:$0xff] }
  0x50   :  { %703 = vmatpush1.bf16.msra.mxu1 %v702_v56  ;;  %641 = vmatprep.subr.bf16.mxu0 %v640_v57  ;;  %v103_v56 = vld [vmem:[#allocation2 + $0x260] sm:$0xff]  ;;  %v97_v57 = vld [vmem:[#allocation2 + $0x230] sm:$0xff]  ;;  %v804_v44 = vpack.c.bf16 %v170_v37, %v162_v36  ;;  %v186_v49 = vld [vmem:[#allocation2 + $0x4f8] sm:$0xff] }
  0x51   :  { %705 = vmatprep.subr.bf16.mxu1 %v704_v61  ;;  %v120_v61 = vld [vmem:[#allocation2 + $0x2e8] sm:$0xff]  ;;  %v726_v0 = vpack.c.bf16 %v103_v56, %v95_v55  ;;  %v790_v1 = vpack.c.bf16 %v105_v59, %v97_v57  ;;  %v185_v56 = vld [vmem:[#allocation2 + $0x4f0] sm:$0xff]  ;;  %v194_v59 = vld [vmem:[#allocation2 + $0x538] sm:$0xff] }
  0x52   :  { %v728_v2 = vpack.c.bf16 %v120_v61, %v112_v60  ;;  %v192_v57 = vld [vmem:[#allocation2 + $0x528] sm:$0xff]  ;;  %v202_v60 = vld [vmem:[#allocation2 + $0x578] sm:$0xff] }
  0x53   :  { %643 = vmatpush1.bf16.msra.mxu0 %v642_v3  ;;  %v111_v3 = vld [vmem:[#allocation2 + $0x2a0] sm:$0xff] }
  0x54   :  { %707 = vmatpush1.bf16.msra.mxu1 %v706_v4  ;;  %709 = vmatprep.subr.bf16.mxu0 %v708_v5  ;;  %v119_v4 = vld [vmem:[#allocation2 + $0x2e0] sm:$0xff]  ;;  %v113_v5 = vld [vmem:[#allocation2 + $0x2b0] sm:$0xff] }
  0x55   :  { %773 = vmatprep.subr.bf16.mxu1 %v772_v9  ;;  %v136_v9 = vld [vmem:[#allocation2 + $0x368] sm:$0xff]  ;;  %v730_v12 = vpack.c.bf16 %v119_v4, %v111_v3  ;;  %v794_v13 = vpack.c.bf16 %v121_v7, %v113_v5  ;;  %v812_v3 = vpack.c.bf16 %v202_v60, %v194_v59  ;;  %v201_v4 = vld [vmem:[#allocation2 + $0x570] sm:$0xff]  ;;  %v210_v7 = vld [vmem:[#allocation2 + $0x5b8] sm:$0xff] }
  0x56   :  { %348 = vmatmul.mubr.f32.vlgmr.msra.gmra.mrb[0].mxu0 %v903_v15  ;;  %v732_v14 = vpack.c.bf16 %v136_v9, %v128_v8  ;;  %v208_v5 = vld [vmem:[#allocation2 + $0x5a8] sm:$0xff]  ;;  %v218_v8 = vld [vmem:[#allocation2 + $0x5f8] sm:$0xff] }
  0x57   :  { %419 = vmatmul.mubr.f32.vlgmr.msra.gmra.mrb[0].mxu1 %v903_v15  ;;  %711 = vmatpush1.bf16.msra.mxu0 %v710_v17  ;;  %v127_v17 = vld [vmem:[#allocation2 + $0x320] sm:$0xff] }
  0x58   :  { %775 = vmatpush1.bf16.msra.mxu1 %v774_v18  ;;  %713 = vmatprep.subr.bf16.mxu0 %v712_v19  ;;  %v135_v18 = vld [vmem:[#allocation2 + $0x360] sm:$0xff]  ;;  %v129_v19 = vld [vmem:[#allocation2 + $0x330] sm:$0xff] }
  0x59   :  { %777 = vmatprep.subr.bf16.mxu1 %v776_v23  ;;  %489 = vmatprep.mubr.f32.mxu0 %v896_v16  ;;  %v152_v23 = vld [vmem:[#allocation2 + $0x3e8] sm:$0xff]  ;;  %v734_v26 = vpack.c.bf16 %v135_v18, %v127_v17  ;;  %v798_v27 = vpack.c.bf16 %v137_v21, %v129_v19  ;;  %v816_v17 = vpack.c.bf16 %v218_v8, %v210_v7  ;;  %v217_v18 = vld [vmem:[#allocation2 + $0x5f0] sm:$0xff]  ;;  %v226_v21 = vld [vmem:[#allocation2 + $0x638] sm:$0xff] }
  0x5a   :  { %560 = vmatprep.mubr.f32.mxu1 %v896_v16  ;;  %v786_v16 = vpack.c.bf16 %v89_v48, %v81_v46  ;;  %v736_v28 = vpack.c.bf16 %v152_v23, %v144_v22  ;;  %v176_v46 = vld [vmem:[#allocation2 + $0x4a8] sm:$0xff]  ;;  %v178_v48 = vld [vmem:[#allocation2 + $0x4b8] sm:$0xff] }
  0x5b   :  { %715 = vmatpush1.bf16.msra.mxu0 %v714_v29  ;;  %v143_v29 = vld [vmem:[#allocation2 + $0x3a0] sm:$0xff]  ;;  %v808_v55 = vpack.c.bf16 %v186_v49, %v178_v48  ;;  %v224_v19 = vld [vmem:[#allocation2 + $0x628] sm:$0xff]  ;;  %v234_v22 = vld [vmem:[#allocation2 + $0x678] sm:$0xff] }
  0x5c   :  { %779 = vmatpush1.bf16.msra.mxu1 %v778_v30  ;;  %717 = vmatprep.subr.bf16.mxu0 %v716_v31  ;;  %v151_v30 = vld [vmem:[#allocation2 + $0x3e0] sm:$0xff]  ;;  %v145_v31 = vld [vmem:[#allocation2 + $0x3b0] sm:$0xff] }
  0x5d   :  { %781 = vmatprep.subr.bf16.mxu1 %v780_v35  ;;  %v168_v35 = vld [vmem:[#allocation2 + $0x468] sm:$0xff]  ;;  %v738_v38 = vpack.c.bf16 %v151_v30, %v143_v29  ;;  %v802_v39 = vpack.c.bf16 %v153_v33, %v145_v31  ;;  %v820_v29 = vpack.c.bf16 %v234_v22, %v226_v21  ;;  %v233_v30 = vld [vmem:[#allocation2 + $0x670] sm:$0xff]  ;;  %v242_v33 = vld [vmem:[#allocation2 + $0x6b8] sm:$0xff] }
  0x5e   :  { %v740_v40 = vpack.c.bf16 %v168_v35, %v160_v34  ;;  %v240_v31 = vld [vmem:[#allocation2 + $0x6a8] sm:$0xff]  ;;  %v250_v34 = vld [vmem:[#allocation2 + $0x6f8] sm:$0xff] }
  0x5f   :  { %719 = vmatpush1.bf16.msra.mxu0 %v718_v41  ;;  %v159_v41 = vld [vmem:[#allocation2 + $0x420] sm:$0xff] }
  0x60   :  { %783 = vmatpush1.bf16.msra.mxu1 %v782_v42  ;;  %721 = vmatprep.subr.bf16.mxu0 %v720_v43  ;;  %v167_v42 = vld [vmem:[#allocation2 + $0x460] sm:$0xff]  ;;  %v161_v43 = vld [vmem:[#allocation2 + $0x430] sm:$0xff] }
  0x61   :  { %785 = vmatprep.subr.bf16.mxu1 %v784_v47  ;;  %v184_v47 = vld [vmem:[#allocation2 + $0x4e8] sm:$0xff]  ;;  %v742_v50 = vpack.c.bf16 %v167_v42, %v159_v41  ;;  %v806_v51 = vpack.c.bf16 %v169_v45, %v161_v43  ;;  %v824_v41 = vpack.c.bf16 %v250_v34, %v242_v33  ;;  %v249_v42 = vld [vmem:[#allocation2 + $0x6f0] sm:$0xff]  ;;  %v258_v45 = vld [vmem:[#allocation2 + $0x738] sm:$0xff] }
  0x62   :  { %v744_v52 = vpack.c.bf16 %v184_v47, %v176_v46  ;;  %v256_v43 = vld [vmem:[#allocation2 + $0x728] sm:$0xff]  ;;  %v266_v46 = vld [vmem:[#allocation2 + $0x778] sm:$0xff] }
  0x63   :  { %723 = vmatpush1.bf16.msra.mxu0 %v722_v53  ;;  %v175_v53 = vld [vmem:[#allocation2 + $0x4a0] sm:$0xff] }
  0x64   :  { %787 = vmatpush1.bf16.msra.mxu1 %v786_v16  ;;  %725 = vmatprep.subr.bf16.mxu0 %v724_v54  ;;  %v183_v16 = vld [vmem:[#allocation2 + $0x4e0] sm:$0xff]  ;;  %v177_v54 = vld [vmem:[#allocation2 + $0x4b0] sm:$0xff] }
  0x65   :  { %789 = vmatprep.subr.bf16.mxu1 %v788_v58  ;;  %v200_v58 = vld [vmem:[#allocation2 + $0x568] sm:$0xff]  ;;  %v746_v61 = vpack.c.bf16 %v183_v16, %v175_v53  ;;  %v810_v62 = vpack.c.bf16 %v185_v56, %v177_v54  ;;  %v828_v53 = vpack.c.bf16 %v266_v46, %v258_v45  ;;  %v265_v16 = vld [vmem:[#allocation2 + $0x770] sm:$0xff]  ;;  %v274_v56 = vld [vmem:[#allocation2 + $0x7b8] sm:$0xff] }
  0x66   :  { %v748_v63 = vpack.c.bf16 %v200_v58, %v192_v57  ;;  %v272_v54 = vld [vmem:[#allocation2 + $0x7a8] sm:$0xff]  ;;  %v282_v57 = vld [vmem:[#allocation2 + $0x7f8] sm:$0xff] }
  0x67   :  { %727 = vmatpush1.bf16.msra.mxu0 %v726_v0  ;;  %v191_v0 = vld [vmem:[#allocation2 + $0x520] sm:$0xff] }
  0x68   :  { %791 = vmatpush1.bf16.msra.mxu1 %v790_v1  ;;  %729 = vmatprep.subr.bf16.mxu0 %v728_v2  ;;  %v199_v1 = vld [vmem:[#allocation2 + $0x560] sm:$0xff]  ;;  %v193_v2 = vld [vmem:[#allocation2 + $0x530] sm:$0xff] }
  0x69   :  { %793 = vmatprep.subr.bf16.mxu1 %v792_v6  ;;  %v216_v6 = vld [vmem:[#allocation2 + $0x5e8] sm:$0xff]  ;;  %v750_v9 = vpack.c.bf16 %v199_v1, %v191_v0  ;;  %v814_v10 = vpack.c.bf16 %v201_v4, %v193_v2  ;;  %v273_v0 = vld [vmem:[#allocation2 + $0x7b0] sm:$0xff] }
  0x6a   :  { %v752_v11 = vpack.c.bf16 %v216_v6, %v208_v5  ;;  %v281_v1 = vld [vmem:[#allocation2 + $0x7f0] sm:$0xff] }
  0x6b   :  { %731 = vmatpush1.bf16.msra.mxu0 %v730_v12  ;;  %v207_v12 = vld [vmem:[#allocation2 + $0x5a0] sm:$0xff] }
  0x6c   :  { %795 = vmatpush1.bf16.msra.mxu1 %v794_v13  ;;  %733 = vmatprep.subr.bf16.mxu0 %v732_v14  ;;  %v215_v13 = vld [vmem:[#allocation2 + $0x5e0] sm:$0xff]  ;;  %v209_v14 = vld [vmem:[#allocation2 + $0x5b0] sm:$0xff] }
  0x6d   :  { %797 = vmatprep.subr.bf16.mxu1 %v796_v20  ;;  %v232_v20 = vld [vmem:[#allocation2 + $0x668] sm:$0xff]  ;;  %v754_v23 = vpack.c.bf16 %v215_v13, %v207_v12  ;;  %v818_v24 = vpack.c.bf16 %v217_v18, %v209_v14 }
  0x6e   :  { %v756_v25 = vpack.c.bf16 %v232_v20, %v224_v19 }
  0x6f   :  { %735 = vmatpush1.bf16.msra.mxu0 %v734_v26  ;;  %v223_v26 = vld [vmem:[#allocation2 + $0x620] sm:$0xff] }
  0x70   :  { %799 = vmatpush1.bf16.msra.mxu1 %v798_v27  ;;  %737 = vmatprep.subr.bf16.mxu0 %v736_v28  ;;  %v231_v27 = vld [vmem:[#allocation2 + $0x660] sm:$0xff]  ;;  %v225_v28 = vld [vmem:[#allocation2 + $0x630] sm:$0xff] }
  0x71   :  { %801 = vmatprep.subr.bf16.mxu1 %v800_v32  ;;  %v248_v32 = vld [vmem:[#allocation2 + $0x6e8] sm:$0xff]  ;;  %v758_v35 = vpack.c.bf16 %v231_v27, %v223_v26  ;;  %v822_v36 = vpack.c.bf16 %v233_v30, %v225_v28 }
  0x72   :  { %v760_v37 = vpack.c.bf16 %v248_v32, %v240_v31 }
  0x73   :  { %739 = vmatpush1.bf16.msra.mxu0 %v738_v38  ;;  %v239_v38 = vld [vmem:[#allocation2 + $0x6a0] sm:$0xff] }
  0x74   :  { %803 = vmatpush1.bf16.msra.mxu1 %v802_v39  ;;  %741 = vmatprep.subr.bf16.mxu0 %v740_v40  ;;  %v247_v39 = vld [vmem:[#allocation2 + $0x6e0] sm:$0xff]  ;;  %v241_v40 = vld [vmem:[#allocation2 + $0x6b0] sm:$0xff] }
  0x75   :  { %805 = vmatprep.subr.bf16.mxu1 %v804_v44  ;;  %v264_v44 = vld [vmem:[#allocation2 + $0x768] sm:$0xff]  ;;  %v762_v47 = vpack.c.bf16 %v247_v39, %v239_v38  ;;  %v826_v48 = vpack.c.bf16 %v249_v42, %v241_v40 }
  0x76   :  { %v764_v49 = vpack.c.bf16 %v264_v44, %v256_v43 }
  0x77   :  { %743 = vmatpush1.bf16.msra.mxu0 %v742_v50  ;;  %v255_v50 = vld [vmem:[#allocation2 + $0x720] sm:$0xff] }
  0x78   :  { %807 = vmatpush1.bf16.msra.mxu1 %v806_v51  ;;  %745 = vmatprep.subr.bf16.mxu0 %v744_v52  ;;  %v263_v51 = vld [vmem:[#allocation2 + $0x760] sm:$0xff]  ;;  %v257_v52 = vld [vmem:[#allocation2 + $0x730] sm:$0xff] }
  0x79   :  { %809 = vmatprep.subr.bf16.mxu1 %v808_v55  ;;  %v280_v55 = vld [vmem:[#allocation2 + $0x7e8] sm:$0xff]  ;;  %v766_v58 = vpack.c.bf16 %v263_v51, %v255_v50  ;;  %v830_v59 = vpack.c.bf16 %v265_v16, %v257_v52 }
  0x7a   :  { %v768_v60 = vpack.c.bf16 %v280_v55, %v272_v54 }
  0x7b   :  { %747 = vmatpush1.bf16.msra.mxu0 %v746_v61  ;;  %v271_v61 = vld [vmem:[#allocation2 + $0x7a0] sm:$0xff] }
  0x7c   :  { %811 = vmatpush1.bf16.msra.mxu1 %v810_v62  ;;  %749 = vmatprep.subr.bf16.mxu0 %v748_v63  ;;  %v279_v62 = vld [vmem:[#allocation2 + $0x7e0] sm:$0xff]  ;;  %v832_v63 = vpack.c.bf16 %v282_v57, %v274_v56 }
  0x7d   :  { %813 = vmatprep.subr.bf16.mxu1 %v812_v3  ;;  %v770_v2 = vpack.c.bf16 %v279_v62, %v271_v61  ;;  %v834_v3 = vpack.c.bf16 %v281_v1, %v273_v0 }
  0x7f   :  { %751 = vmatpush1.bf16.msra.mxu0 %v750_v9 }
  0x80   :  { %815 = vmatpush1.bf16.msra.mxu1 %v814_v10  ;;  %753 = vmatprep.subr.bf16.mxu0 %v752_v11 }
  0x81   :  { %817 = vmatprep.subr.bf16.mxu1 %v816_v17 }
  0x83   :  { %755 = vmatpush1.bf16.msra.mxu0 %v754_v23 }
  0x84   :  { %819 = vmatpush1.bf16.msra.mxu1 %v818_v24  ;;  %757 = vmatprep.subr.bf16.mxu0 %v756_v25 }
  0x85   :  { %821 = vmatprep.subr.bf16.mxu1 %v820_v29 }
  0x87   :  { %759 = vmatpush1.bf16.msra.mxu0 %v758_v35 }
  0x88   :  { %823 = vmatpush1.bf16.msra.mxu1 %v822_v36  ;;  %761 = vmatprep.subr.bf16.mxu0 %v760_v37 }
  0x89   :  { %825 = vmatprep.subr.bf16.mxu1 %v824_v41 }
  0x8b   :  { %763 = vmatpush1.bf16.msra.mxu0 %v762_v47 }
  0x8c   :  { %827 = vmatpush1.bf16.msra.mxu1 %v826_v48  ;;  %765 = vmatprep.subr.bf16.mxu0 %v764_v49 }
  0x8d   :  { %829 = vmatprep.subr.bf16.mxu1 %v828_v53 }
  0x8f   :  { %767 = vmatpush1.bf16.msra.mxu0 %v766_v58 }
  0x90   :  { %831 = vmatpush1.bf16.msra.mxu1 %v830_v59  ;;  %769 = vmatprep.subr.bf16.mxu0 %v768_v60 }
  0x91   :  { %833 = vmatprep.subr.bf16.mxu1 %v832_v63 }
  0x93   :  { %771 = vmatpush1.bf16.msra.mxu0 %v770_v2 }
  0x94   :  { %835 = vmatpush1.bf16.msra.mxu1 %v834_v3 }
  0x96   :  { %490 = vmatmul.mubr.f32.vlgmr.msra.gmra.mrb[2].mxu0 %v903_v15 }
  0x97   :  { %561 = vmatmul.mubr.f32.vlgmr.msra.gmra.mrb[2].mxu1 %v903_v15 }
 0x129   :  { %v349_v4 = vpop.f32.mrb[0].mxu0 }
 0x12a   :  { %567 = vst [vmem:[%s937_s2] sm:$0xff] %v349_v4  ;;  %v420_v5 = vpop.f32.mrb[0].mxu1  ;;  %v351_v6 = vpop.f32.mrb[1].mxu0 }
 0x12b   :  { %569 = vst [vmem:[%s937_s2 + $0x10] sm:$0xff] %v420_v5  ;;  %568 = vst [vmem:[%s937_s2 + $0x8] sm:$0xff] %v351_v6  ;;  %v422_v7 = vpop.f32.mrb[1].mxu1 }
 0x12c   :  { %570 = vst [vmem:[%s937_s2 + $0x18] sm:$0xff] %v422_v7 }
 0x169   :  { %v491_v15 = vpop.f32.mrb[2].mxu0 }
 0x16a   :  { %571 = vst [vmem:[%s937_s2 + $0x20] sm:$0xff] %v491_v15  ;;  %v562_v8 = vpop.f32.mrb[2].mxu1  ;;  %v493_v9 = vpop.f32.mrb[3].mxu0 }
 0x16b   :  { %573 = vst [vmem:[%s937_s2 + $0x30] sm:$0xff] %v562_v8  ;;  %572 = vst [vmem:[%s937_s2 + $0x28] sm:$0xff] %v493_v9  ;;  %v564_v10 = vpop.f32.mrb[3].mxu1 }
 0x16c   :  { %574 = vst [vmem:[%s937_s2 + $0x38] sm:$0xff] %v564_v10 }
 0x16d   :  { %579 = vsyncpa [#allocation3], 1 }

</bundles_post_ra>
